<compile_context>
chip_gen: v5e
topology: v5e:2x2
jax: 0.10.0
libtpu: 0.0.40
codegen_flags: <defaults>
</compile_context>

<pallas_src>
from functools import partial

import jax
import jax.numpy as jnp
from jax.experimental import pallas as pl
from jax.experimental.pallas import tpu as pltpu

LANE = 128


def attention_kernel(inp_ref, src_ref, w_in_ref, w_out_mix_ref, w_out_in_ref,
                     out_ref, attn_ref, *, bb, t, approx_recip):
    # inp_ref  : (Bb*T, Din_p)   -- already row-flat: the DMA'd tile IS the operand
    # src_ref  : (Bb, S, Dsrc_p)
    # w_in_ref : (Din_p, Dsrc_p)  w_out_mix_ref: (Dsrc_p, Dout_p)  w_out_in_ref: (Din_p, Dout_p)
    # out_ref  : (Bb*T, Dout_p)   attn_ref: (Bb, T, S)
    cd = w_in_ref.dtype                           # MXU operand dtype (f32 or bf16)

    inp_mm = inp_ref[...].astype(cd)              # (Bb*T, Din_p)
    src = src_ref[...].astype(cd)                 # (Bb, S, Dsrc_p)

    # x = input_proj(input): one fused (Bb*T, Din_p) x (Din_p, Dsrc_p) matmul.
    x = jnp.dot(inp_mm, w_in_ref[...], preferred_element_type=jnp.float32)
    x = x.reshape(bb, t, -1).astype(cd)           # (Bb, T, Dsrc_p)

    # attn logits = bmm(x, source_hids^T): contract last dims directly
    # (batch dim 0) -- no materialized transpose.
    logits = jax.lax.dot_general(
        x, src,
        dimension_numbers=(((2,), (2,)), ((0,), (0,))),
        preferred_element_type=jnp.float32)       # (Bb, T, S)

    # Numerically stable softmax over S (elementwise math stays f32).
    m = jnp.max(logits, axis=-1, keepdims=True)
    e = jnp.exp(logits - m)
    denom = jnp.sum(e, axis=-1, keepdims=True)
    attn = e * pl.reciprocal(denom, approx=approx_recip)    # (Bb, T, S) f32

    # mix = bmm(attn, source_hids): (Bb, T, Dsrc_p)
    mix = jax.lax.dot_general(
        attn.astype(cd), src,
        dimension_numbers=(((2,), (1,)), ((0,), (0,))),
        preferred_element_type=jnp.float32)

    # output = tanh( mix @ W_out_mix + input @ W_out_in )
    #        == tanh( cat(mix, input) @ W_out^T )           (exact, no concat)
    mix_mm = mix.reshape(bb * t, -1).astype(cd)
    pre = (jnp.dot(mix_mm, w_out_mix_ref[...], preferred_element_type=jnp.float32)
           + jnp.dot(inp_mm, w_out_in_ref[...], preferred_element_type=jnp.float32))

    out_ref[...] = jnp.tanh(pre).astype(out_ref.dtype)      # (Bb*T, Dout_p)
    attn_ref[...] = attn.astype(attn_ref.dtype)             # (Bb, T, S)


def _round_up(x, m):
    return (x + m - 1) // m * m


def _default_row_target():
    """Generation-aware fused-row (M) target for the two projections."""
    try:
        kind = jax.devices()[0].device_kind.lower()
    except Exception:
        return 256
    if "v6" in kind:
        return 512      # v6e: 2x256^2 MXU -> M of 512 keeps the array full
    return 256          # v5e: 4x128^2 MXU; v7x: 64 MiB VMEM-bound


def _vmem_footprint(bb, t, s, d_in_p, d_src_p, d_out_p):
    """Rough per-step VMEM bytes: double-buffered I/O tiles + live f32 temps + weights."""
    rows = bb * t
    f32 = 4
    inputs = 2 * f32 * (rows * d_in_p + bb * s * d_src_p)        # double-buffered inputs
    outputs = 2 * f32 * (rows * d_out_p + rows * s)              # double-buffered outputs
    live = 3 * f32 * rows * s + 2 * f32 * rows * d_src_p         # logits/e/attn + x/mix
    weights = 2 * f32 * (d_in_p * d_src_p + d_src_p * d_out_p + d_in_p * d_out_p)
    return inputs + outputs + live + weights


def _pick_batch_block(B, T, S, d_in_p, d_src_p, d_out_p, *,
                      target_rows=None, vmem_budget=24 << 20):
    """Largest divisor Bb of B such that:
       * Bb*T is sublane-aligned (% 8 == 0) or spans the full B*T extent,
       * Bb <= B/2 so >=2 grid steps exist (v7x megacore sharding),
       * the per-step VMEM footprint stays under `vmem_budget` (v7x = 64 MiB),
       * the fused row count Bb*T stays near the MXU-friendly `target_rows`."""
    if target_rows is None:
        target_rows = _default_row_target()
    candidates = []
    for bb in range(1, B + 1):
        if B % bb:
            continue
        rows = bb * T
        if rows % 8 and bb != B:
            continue
        if B >= 2 and bb > B // 2:
            continue
        if _vmem_footprint(bb, T, S, d_in_p, d_src_p, d_out_p) > vmem_budget:
            continue
        candidates.append(bb)
    if not candidates:
        return B                                   # full extent is always layout-legal
    small = [bb for bb in candidates if bb * T <= target_rows]
    return max(small) if small else min(candidates)


@partial(jax.jit, static_argnames=("compute_dtype", "approx_recip",
                                   "attn_dtype", "batch_block"))
def attention_forward(inp, source_hids, w_in_proj, w_out_proj, *,
                      compute_dtype=jnp.float32, approx_recip=False,
                      attn_dtype=jnp.float32, batch_block=None):
    """
    inp          : (B, T, input_dim)                      float32
    source_hids  : (B, S, source_dim)                     float32
    w_in_proj    : (source_dim, input_dim)                PyTorch Linear weight layout
    w_out_proj   : (output_dim, input_dim + source_dim)   PyTorch Linear weight layout
    returns (output (B, T, output_dim) f32, attn (B, T, S) attn_dtype).

    compute_dtype=jnp.bfloat16 is the recommended fast path on v6e/v7x (MXU
    operands only; accumulation / softmax / tanh stay f32).  The f32 default
    reproduces the PyTorch forward to 1e-5.
    """
    B, T, Din = inp.shape
    Bs, S, Dsrc = source_hids.shape
    assert Bs == B
    Dout = w_out_proj.shape[0]
    assert w_in_proj.shape == (Dsrc, Din)
    assert w_out_proj.shape == (Dout, Din + Dsrc)

    # Lane-dense (multiple-of-128) feature dims; S is deliberately NOT padded.
    Din_p, Dsrc_p, Dout_p = (_round_up(d, LANE) for d in (Din, Dsrc, Dout))

    Bb = (_pick_batch_block(B, T, S, Din_p, Dsrc_p, Dout_p)
          if batch_block is None else batch_block)
    assert B % Bb == 0, "batch_block must divide the batch size"
    grid = (B // Bb,)

    # Weights in "x @ W" layout, output projection split along its input axis
    # (cat(mix, input) @ W_out^T == mix @ W_mix + input @ W_inp, exact), then
    # zero-padded to lane-dense K / N.
    w_in_t = jnp.pad(jnp.transpose(w_in_proj),
                     ((0, Din_p - Din), (0, Dsrc_p - Dsrc))).astype(compute_dtype)
    w_out_t = jnp.transpose(w_out_proj)                        # (Dsrc + Din, Dout)
    w_out_mix_t = jnp.pad(w_out_t[:Dsrc, :],
                          ((0, Dsrc_p - Dsrc), (0, Dout_p - Dout))).astype(compute_dtype)
    w_out_in_t = jnp.pad(w_out_t[Dsrc:, :],
                         ((0, Din_p - Din), (0, Dout_p - Dout))).astype(compute_dtype)

    # Row-flatten the input in the wrapper (the DMA'd tile IS the matmul
    # operand -- no in-kernel reshape copy) and zero-pad the feature dims.
    inp_flat = jnp.pad(inp.reshape(B * T, Din), ((0, 0), (0, Din_p - Din)))
    src_pad = jnp.pad(source_hids, ((0, 0), (0, 0), (0, Dsrc_p - Dsrc)))

    vmem_limit = int(min(64 << 20,
                         max(32 << 20,
                             2 * _vmem_footprint(Bb, T, S, Din_p, Dsrc_p, Dout_p))))

    out_shapes = (
        jax.ShapeDtypeStruct((B * T, Dout_p), jnp.float32),    # lane-dense row slab
        jax.ShapeDtypeStruct((B, T, S), attn_dtype),
    )

    out_flat, attn = pl.pallas_call(
        partial(attention_kernel, bb=Bb, t=T, approx_recip=approx_recip),
        out_shape=out_shapes,
        grid=grid,
        in_specs=[
            pl.BlockSpec((Bb * T, Din_p), lambda b: (b, 0)),
            pl.BlockSpec((Bb, S, Dsrc_p), lambda b: (b, 0, 0)),
            # Constant index maps: weight tiles stay resident across grid steps.
            # (pl.Buffered(1) could drop their redundant second buffer; left at
            #  the default for portability -- they are < 200 KiB here.)
            pl.BlockSpec((Din_p, Dsrc_p), lambda b: (0, 0)),
            pl.BlockSpec((Dsrc_p, Dout_p), lambda b: (0, 0)),
            pl.BlockSpec((Din_p, Dout_p), lambda b: (0, 0)),
        ],
        out_specs=(
            pl.BlockSpec((Bb * T, Dout_p), lambda b: (b, 0)),
            pl.BlockSpec((Bb, T, S), lambda b: (b, 0, 0)),
        ),
        compiler_params=pltpu.CompilerParams(
            dimension_semantics=("parallel",),
            vmem_limit_bytes=vmem_limit),
    )(inp_flat, src_pad, w_in_t, w_out_mix_t, w_out_in_t)

    output = out_flat[:, :Dout].reshape(B, T, Dout)   # drop padded output columns
    return output, attn


def attention_reference(inp, source_hids, w_in_proj, w_out_proj):
    """Pure-JAX reference mirroring the PyTorch forward exactly."""
    x = jnp.einsum('btd,sd->bts', inp, w_in_proj)                  # input_proj
    attn = jnp.einsum('bts,bks->btk', x, source_hids)              # bmm(x, src^T)
    attn = jax.nn.softmax(attn, axis=-1)
    mix = jnp.einsum('btk,bkd->btd', attn, source_hids)            # bmm(attn, src)
    combined = jnp.concatenate([mix, inp], axis=2)
    out = jnp.tanh(jnp.einsum('btc,oc->bto', combined, w_out_proj))
    return out, attn


if __name__ == "__main__":
    # Small shapes consistent with the module's forward.
    B, T, S = 2, 8, 8
    input_dim = 32
    source_dim = 32   # default: source_dim = input_dim
    output_dim = 32   # default: output_dim = input_dim

    key = jax.random.PRNGKey(0)
    k_inp, k_src, k_w1, k_w2 = jax.random.split(key, 4)

    inp = jax.random.normal(k_inp, (B, T, input_dim), dtype=jnp.float32)
    source_hids = jax.random.normal(k_src, (B, S, source_dim), dtype=jnp.float32)

    # Deterministic synthetic parameters (PyTorch Linear weight layout, bias=False).
    w_in_proj = jax.random.normal(k_w1, (source_dim, input_dim), dtype=jnp.float32) * 0.1
    w_out_proj = jax.random.normal(
        k_w2, (output_dim, input_dim + source_dim), dtype=jnp.float32) * 0.1

    out_ref, attn_ref = attention_reference(inp, source_hids, w_in_proj, w_out_proj)

    # 1) Exact path: f32 MXU operands, exact reciprocal -> matches reference to 1e-5.
    out, attn = attention_forward(inp, source_hids, w_in_proj, w_out_proj,
                                  compute_dtype=jnp.float32, approx_recip=False)
    out, attn = jax.block_until_ready((out, attn))
    assert out.shape == (B, T, output_dim)
    assert attn.shape == (B, T, S)
    assert jnp.allclose(out, out_ref, atol=1e-5, rtol=1e-5)
    assert jnp.allclose(attn, attn_ref, atol=1e-5, rtol=1e-5)

    # 2) Fast path (v6e/v7x recipe): bf16 MXU operands + EUP approx reciprocal,
    #    f32 accumulation / softmax / tanh.  Checked at a bf16-appropriate tolerance.
    out_f, attn_f = attention_forward(inp, source_hids, w_in_proj, w_out_proj,
                                      compute_dtype=jnp.bfloat16, approx_recip=True)
    out_f, attn_f = jax.block_until_ready((out_f, attn_f))
    assert jnp.allclose(out_f, out_ref, atol=5e-2, rtol=5e-2)
    assert jnp.allclose(attn_f, attn_ref, atol=5e-2, rtol=5e-2)

    print("KERNEL_OK")
</pallas_src>

<mosaic_0001>
module attributes {stable_mosaic.version = 11 : i64} {
  func.func @attention_kernel(%arg0: i32, %arg1: memref<8x128xf32, #tpu.memory_space<vmem>>, %arg2: memref<1x8x128xf32, #tpu.memory_space<vmem>>, %arg3: memref<128x128xf32, #tpu.memory_space<vmem>>, %arg4: memref<128x128xf32, #tpu.memory_space<vmem>>, %arg5: memref<128x128xf32, #tpu.memory_space<vmem>>, %arg6: memref<8x128xf32, #tpu.memory_space<vmem>>, %arg7: memref<1x8x8xf32, #tpu.memory_space<vmem>>) attributes {dimension_semantics = [#tpu.dimension_semantics<parallel>], iteration_bounds = array<i64: 2>, scalar_prefetch = 0 : i64, scratch_operands = 0 : i64, tpu.core_type = #tpu.core_type<tc>, window_params = [{transform_indices = @transform_0, window_bounds = array<i64: 8, 128>}, {transform_indices = @transform_1, window_bounds = array<i64: 1, 8, 128>}, {pipeline_mode = #tpu.pipeline_mode<synchronous>, transform_indices = @transform_2, window_bounds = array<i64: 128, 128>}, {pipeline_mode = #tpu.pipeline_mode<synchronous>, transform_indices = @transform_3, window_bounds = array<i64: 128, 128>}, {pipeline_mode = #tpu.pipeline_mode<synchronous>, transform_indices = @transform_4, window_bounds = array<i64: 128, 128>}, {transform_indices = @transform_5, window_bounds = array<i64: 8, 128>}, {transform_indices = @transform_6, window_bounds = array<i64: 1, 8, 8>}]} {
    %c0 = arith.constant 0 : index
    %c0_0 = arith.constant 0 : index
    %0 = vector.load %arg1[%c0, %c0_0] : memref<8x128xf32, #tpu.memory_space<vmem>>, vector<8x128xf32>
    %c0_1 = arith.constant 0 : index
    %c0_2 = arith.constant 0 : index
    %c0_3 = arith.constant 0 : index
    %1 = vector.load %arg2[%c0_1, %c0_2, %c0_3] : memref<1x8x128xf32, #tpu.memory_space<vmem>>, vector<1x8x128xf32>
    %c0_4 = arith.constant 0 : index
    %c0_5 = arith.constant 0 : index
    %2 = vector.load %arg3[%c0_4, %c0_5] : memref<128x128xf32, #tpu.memory_space<vmem>>, vector<128x128xf32>
    %cst = arith.constant dense<0.000000e+00> : vector<8x128xf32>
    %3 = tpu.matmul %0, %2, %cst {dimension_numbers = #tpu.dot_dimension_numbers<[1], [0], [0], [1], [0, 0, 1, 1], [], []>} : vector<8x128xf32>, vector<128x128xf32>, vector<8x128xf32> -> vector<8x128xf32>
    %4 = vector.shape_cast %3 : vector<8x128xf32> to vector<1x8x128xf32>
    %cst_6 = arith.constant dense<0.000000e+00> : vector<1x8x8xf32>
    %5 = tpu.matmul %4, %1, %cst_6 {dimension_numbers = #tpu.dot_dimension_numbers<[2], [2], [1], [1], [0, 0, 0, 1, 1, 1], [0], [0]>} : vector<1x8x128xf32>, vector<1x8x128xf32>, vector<1x8x8xf32> -> vector<1x8x8xf32>
    %cst_7 = arith.constant dense<0xFF800000> : vector<1x8xf32>
    %6 = vector.multi_reduction <maximumf>, %5, %cst_7 [2] : vector<1x8x8xf32> to vector<1x8xf32>
    %7 = vector.shape_cast %6 : vector<1x8xf32> to vector<1x8x1xf32>
    %8 = vector.broadcast %7 : vector<1x8x1xf32> to vector<1x8x8xf32>
    %9 = arith.subf %5, %8 : vector<1x8x8xf32>
    %10 = math.exp %9 : vector<1x8x8xf32>
    %cst_8 = arith.constant dense<0.000000e+00> : vector<1x8xf32>
    %11 = vector.multi_reduction <add>, %10, %cst_8 [2] : vector<1x8x8xf32> to vector<1x8xf32>
    %12 = vector.shape_cast %11 : vector<1x8xf32> to vector<1x8x1xf32>
    %13 = tpu.reciprocal %12 : vector<1x8x1xf32> -> vector<1x8x1xf32>
    %14 = vector.broadcast %13 : vector<1x8x1xf32> to vector<1x8x8xf32>
    %15 = arith.mulf %10, %14 : vector<1x8x8xf32>
    %cst_9 = arith.constant dense<0.000000e+00> : vector<1x8x128xf32>
    %16 = tpu.matmul %15, %1, %cst_9 {dimension_numbers = #tpu.dot_dimension_numbers<[2], [1], [1], [2], [0, 0, 0, 1, 1, 2], [0], [0]>} : vector<1x8x8xf32>, vector<1x8x128xf32>, vector<1x8x128xf32> -> vector<1x8x128xf32>
    %17 = vector.shape_cast %16 : vector<1x8x128xf32> to vector<8x128xf32>
    %c0_10 = arith.constant 0 : index
    %c0_11 = arith.constant 0 : index
    %18 = vector.load %arg4[%c0_10, %c0_11] : memref<128x128xf32, #tpu.memory_space<vmem>>, vector<128x128xf32>
    %cst_12 = arith.constant dense<0.000000e+00> : vector<8x128xf32>
    %19 = tpu.matmul %17, %18, %cst_12 {dimension_numbers = #tpu.dot_dimension_numbers<[1], [0], [0], [1], [0, 0, 1, 1], [], []>} : vector<8x128xf32>, vector<128x128xf32>, vector<8x128xf32> -> vector<8x128xf32>
    %c0_13 = arith.constant 0 : index
    %c0_14 = arith.constant 0 : index
    %20 = vector.load %arg5[%c0_13, %c0_14] : memref<128x128xf32, #tpu.memory_space<vmem>>, vector<128x128xf32>
    %cst_15 = arith.constant dense<0.000000e+00> : vector<8x128xf32>
    %21 = tpu.matmul %0, %20, %cst_15 {dimension_numbers = #tpu.dot_dimension_numbers<[1], [0], [0], [1], [0, 0, 1, 1], [], []>} : vector<8x128xf32>, vector<128x128xf32>, vector<8x128xf32> -> vector<8x128xf32>
    %22 = arith.addf %19, %21 : vector<8x128xf32>
    %23 = math.tanh %22 : vector<8x128xf32>
    %c0_16 = arith.constant 0 : index
    %c0_17 = arith.constant 0 : index
    %24 = vector.load %arg6[%c0_16, %c0_17] : memref<8x128xf32, #tpu.memory_space<vmem>>, vector<8x128xf32>
    tpu.vector_store %arg6[%c0_16, %c0_17], %23 {strides = array<i32>} : memref<8x128xf32, #tpu.memory_space<vmem>>, vector<8x128xf32>,
    %c0_18 = arith.constant 0 : index
    %c0_19 = arith.constant 0 : index
    %c0_20 = arith.constant 0 : index
    %25 = vector.load %arg7[%c0_18, %c0_19, %c0_20] : memref<1x8x8xf32, #tpu.memory_space<vmem>>, vector<1x8x8xf32>
    tpu.vector_store %arg7[%c0_18, %c0_19, %c0_20], %15 {strides = array<i32>} : memref<1x8x8xf32, #tpu.memory_space<vmem>>, vector<1x8x8xf32>,
    return
  }
  func.func @transform_0(%arg0: i32) -> (i32, i32) {
    %c0_i32 = arith.constant 0 : i32
    %c0_i32_0 = arith.constant 0 : i32
    return %arg0, %c0_i32 : i32, i32
  }
  func.func @transform_1(%arg0: i32) -> (i32, i32, i32) {
    %c0_i32 = arith.constant 0 : i32
    %c0_i32_0 = arith.constant 0 : i32
    %c0_i32_1 = arith.constant 0 : i32
    return %arg0, %c0_i32, %c0_i32_0 : i32, i32, i32
  }
  func.func @transform_2(%arg0: i32) -> (i32, i32) {
    %c0_i32 = arith.constant 0 : i32
    %c0_i32_0 = arith.constant 0 : i32
    %c0_i32_1 = arith.constant 0 : i32
    return %c0_i32, %c0_i32_0 : i32, i32
  }
  func.func @transform_3(%arg0: i32) -> (i32, i32) {
    %c0_i32 = arith.constant 0 : i32
    %c0_i32_0 = arith.constant 0 : i32
    %c0_i32_1 = arith.constant 0 : i32
    return %c0_i32, %c0_i32_0 : i32, i32
  }
  func.func @transform_4(%arg0: i32) -> (i32, i32) {
    %c0_i32 = arith.constant 0 : i32
    %c0_i32_0 = arith.constant 0 : i32
    %c0_i32_1 = arith.constant 0 : i32
    return %c0_i32, %c0_i32_0 : i32, i32
  }
  func.func @transform_5(%arg0: i32) -> (i32, i32) {
    %c0_i32 = arith.constant 0 : i32
    %c0_i32_0 = arith.constant 0 : i32
    return %arg0, %c0_i32 : i32, i32
  }
  func.func @transform_6(%arg0: i32) -> (i32, i32, i32) {
    %c0_i32 = arith.constant 0 : i32
    %c0_i32_0 = arith.constant 0 : i32
    %c0_i32_1 = arith.constant 0 : i32
    return %arg0, %c0_i32, %c0_i32_0 : i32, i32, i32
  }
}

</mosaic_0001>

<bundles_post_ra>
// kernel: attention_forward.1
= control target key start
LH: loop header
LB: loop body
LE: loop exit
PB: predicated region body
PF: predicated region fallthrough
CT: control target
= control target key end

     0   :  { %12 = vsyncpa [#allocation3], 0  ;;  %s987_s0 = inlined_call_operand.vmem [shape: f32[16,128], index: 0, kind: input, shape index: {}]   ;;  %s988_s1 = inlined_call_operand.vmem [shape: f32[2,8,128], index: 1, kind: input, shape index: {}]   ;;  %s989_s2 = inlined_call_operand.vmem [shape: f32[128,128], index: 2, kind: input, shape index: {}]   ;;  %s990_s3 = inlined_call_operand.vmem [shape: f32[128,128], index: 3, kind: input, shape index: {}]   ;;  %s991_s4 = inlined_call_operand.vmem [shape: f32[128,128], index: 4, kind: input, shape index: {}]   ;;  %s992_s5 = inlined_call_operand.vmem [shape: f32[16,128], index: 5, kind: output, shape index: {0}]   ;;  %s993_s6 = inlined_call_operand.hbm [shape: f32[2,8,8], index: 6, kind: output, shape index: {1}]  }
   0x1   :  { %14 = vsyncpa [#allocation3 + $0x1], 0  ;;  %s731_s21 = smov 0   ;;  %s733_s22 = smov 0  }
   0x2   :  { %s735_s23 = smov 0   ;;  %s737_s24 = smov 0  }
   0x3 LB: > { %s752_s25 = sadd.s32 4294967295, %s694_s24   ;;  %s574_s26 = sadd.s32 4294967294, %s694_s24   ;;  %s694_s24 = sphi %s737_s24, %s999_s24   ;;  %s690_s23 = sphi %s735_s23, %s998_s23   ;;  %s686_s22 = sphi %s733_s22, %s997_s22   ;;  %s682_s21 = sphi %s731_s21, %s996_s21  }
   0x4   : > { %s756_s27 = sadd.s32 1, %s694_s24   ;;  %s168_s28 = sadd.s32 1, %s690_s23 }
   0x5   : > { %s165_s29 = ssub.s32 %s694_s24, %s756_s27  ;;  %p178_p0 = scmp.ne.s32.totalorder %s690_s23, %s686_s22 }
   0x6   : > { %p166_p1 = scmp.eq.s32.totalorder %s165_s29, 0  ;;  %p179_p2 = scmp.eq.s32.totalorder %s752_s25, 1 }
   0x7   : > { %p184_p3 = scmp.ne.s32.totalorder %s686_s22, %s682_s21  ;;  %p185_p4 = scmp.eq.s32.totalorder %s574_s26, 1 }
   0x8   : > { %s767_s30 = scalar_select %p166_p1, %s690_s23, %s168_s28  }
   0x9   : > { %p769_p5 = por %p179_p2, %p178_p0  ;;  %p773_p6 = por %p185_p4, %p184_p3 }
   0xa   : > { %p577_p7 = scmp.ge.s32.totalorder %s694_s24, 1  ;;  %p226_p8 = scmp.lt.s32.totalorder %s694_s24, 3 }
   0xc   : > { %p227_p9 = pnand %p577_p7, %p226_p8 }
   0xd   : > { %p263_p10 = scmp.lt.s32.totalorder (!%p227_p9), %s752_s25, 1  ;;  %s260_s16 = sand.u32 (!%p227_p9), 1, %s686_s22  }
   0xe   : > { %230 = sbr.rel (%p227_p9) target bundleno = 835 (0x343), region = 40  ;;  %s578_s11 = sshll.u32 (!%p227_p9), %s260_s16, 3 }
   0xf   : > { %s262_s12 = scalar_lea.vmem (!%p227_p9), [#allocation2], %s578_s11  ;;  %s584_s19 = sshll.u32 (!%p227_p9), %s752_s25, 3 }
  0x10   : > { %s474_s28 = scalar_lea.hbm (!%p227_p9), %s993_s6, %s584_s19  ;;  %s461_s10 = scalar_lea.sflag (!%p227_p9), [#allocation3], %s260_s16 }
  0x11   : > { %s478_s9 = sshll.u32 (!%p227_p9), %s474_s28, 4  ;;  %s479_s9 = int_to_ptr.hbm [resolvable:$true] %s478_s9 }
  0x12   : > { %s646_s11 = sshra.s32 (!%p227_p9), %s479_s9, 4  ;;  %s647_s11 = int_to_ptr.hbm [resolvable:$true] %s646_s11 }
  0x13   : > { %v292_v0 = vld [vmem:[%s989_s2 + $0x78] sm:$0xff]  ;;  %v291_v1 = vld [vmem:[%s989_s2 + $0x70] sm:$0xff]  ;;  %v290_v2 = vld [vmem:[%s989_s2 + $0x68] sm:$0xff]  ;;  %s264_s15 = scalar_select %p263_p10, %s752_s25, 1  ;;  %vm333_vm0 = vcmask 64512  }
  0x14   : > { %293 = vmatpush.msra.mxu0 %v292_v0  ;;  %v289_v3 = vld [vmem:[%s989_s2 + $0x60] sm:$0xff]  ;;  %v288_v4 = vld [vmem:[%s989_s2 + $0x58] sm:$0xff]  ;;  %v287_v6 = vld [vmem:[%s989_s2 + $0x50] sm:$0xff]  ;;  %s648_s13 = scalar_lea.hbm %s647_s11, 8  ;;  %s652_s25 = scalar_lea.hbm %s993_s6, 16 }
  0x15   : > { %s793_s18 = sshll.u32 %s264_s15, 3  ;;  %v286_v7 = vld [vmem:[%s989_s2 + $0x48] sm:$0xff]  ;;  %v285_v8 = vld [vmem:[%s989_s2 + $0x40] sm:$0xff]  ;;  %v284_v9 = vld [vmem:[%s989_s2 + $0x38] sm:$0xff]  ;;  %p649_p11 = scmp.ne.s32.totalorder %s647_s11, %s648_s13 }
  0x16   : > { %294 = vmatpush.msra.mxu0 %v291_v1  ;;  %s270_s29 = scalar_lea.vmem %s988_s1, %s793_s18  ;;  %v283_v10 = vld [vmem:[%s989_s2 + $0x30] sm:$0xff]  ;;  %v282_v11 = vld [vmem:[%s989_s2 + $0x28] sm:$0xff]  ;;  %v281_v12 = vld [vmem:[%s989_s2 + $0x20] sm:$0xff]  ;;  %s266_s17 = scalar_lea.vmem %s987_s0, %s793_s18 }
  0x17   : > { %v276_v5 = vld [vmem:[%s270_s29] sm:$0xff]  ;;  %v280_v13 = vld [vmem:[%s989_s2 + $0x18] sm:$0xff]  ;;  %v279_v14 = vld [vmem:[%s989_s2 + $0x10] sm:$0xff]  ;;  %s476_s29 = sshll.u32 %s262_s12, 4  ;;  %p650_p12 = pnand %p649_p11, %p769_p5  ;;  %s477_s29 = int_to_ptr.vmem [resolvable:$true] %s476_s29 }
  0x18   : > { %295 = vmatpush.msra.mxu0 %v290_v2  ;;  %328 = vmatpush.xpose.msra.mxu1 %v276_v5  ;;  %v278_v15 = vld [vmem:[%s989_s2 + $0x8] sm:$0xff]  ;;  %v277_v16 = vld [vmem:[%s989_s2] sm:$0xff]  ;;  %v412_v26 = vld [vmem:[%s991_s4 + $0x78] sm:$0xff]  ;;  %p653_p0 = scmp.lt.s32.totalorder %s647_s11, %s993_s6  ;;  %p654_p1 = scmp.lt.s32.totalorder %s652_s25, %s648_s13 }
  0x19   : > { %v839_v17 = vld [vmem:[%s266_s17] sm:$0xff]  ;;  %v396_v27 = vld [vmem:[%s990_s3 + $0x78] sm:$0xff]  ;;  %v411_v28 = vld [vmem:[%s991_s4 + $0x70] sm:$0xff]  ;;  %413 = vmatpush.msra.mxu3 %v412_v26  ;;  %p651_p13 = pneg %p650_p12 }
  0x1a   : > { %296 = vmatpush.msra.mxu0 %v289_v3  ;;  %433 = vmatpush.msra.mxu2 %v396_v27  ;;  %v395_v29 = vld [vmem:[%s990_s3 + $0x70] sm:$0xff]  ;;  %v410_v30 = vld [vmem:[%s991_s4 + $0x68] sm:$0xff]  ;;  %v409_v32 = vld [vmem:[%s991_s4 + $0x60] sm:$0xff]  ;;  %p655_p2 = por %p654_p1, %p653_p0 }
  0x1b   : > { %v394_v31 = vld [vmem:[%s990_s3 + $0x68] sm:$0xff]  ;;  %414 = vmatpush.msra.mxu3 %v411_v28  ;;  %v393_v33 = vld [vmem:[%s990_s3 + $0x60] sm:$0xff]  ;;  %v408_v34 = vld [vmem:[%s991_s4 + $0x58] sm:$0xff] }
  0x1c   : > { %297 = vmatpush.msra.mxu0 %v288_v4  ;;  %376 = vmatpush.msrb.mxu1 %v276_v5  ;;  %v392_v35 = vld [vmem:[%s990_s3 + $0x58] sm:$0xff]  ;;  %v407_v36 = vld [vmem:[%s991_s4 + $0x50] sm:$0xff]  ;;  %v406_v38 = vld [vmem:[%s991_s4 + $0x48] sm:$0xff]  ;;  %p656_p3 = pnand %p655_p2, %p651_p13 }
  0x1d   : > { %434 = vmatpush.msra.mxu2 %v395_v29  ;;  %415 = vmatpush.msra.mxu3 %v410_v30  ;;  %v391_v37 = vld [vmem:[%s990_s3 + $0x50] sm:$0xff]  ;;  %v390_v39 = vld [vmem:[%s990_s3 + $0x48] sm:$0xff]  ;;  %v405_v41 = vld [vmem:[%s991_s4 + $0x40] sm:$0xff] }
  0x1e   : > { %298 = vmatpush.msra.mxu0 %v287_v6  ;;  %v389_v42 = vld [vmem:[%s990_s3 + $0x40] sm:$0xff]  ;;  %v404_v43 = vld [vmem:[%s991_s4 + $0x38] sm:$0xff]  ;;  %v403_v45 = vld [vmem:[%s991_s4 + $0x30] sm:$0xff] }
  0x1f   : > { %435 = vmatpush.msra.mxu2 %v394_v31  ;;  %416 = vmatpush.msra.mxu3 %v409_v32  ;;  %v388_v44 = vld [vmem:[%s990_s3 + $0x38] sm:$0xff]  ;;  %v387_v46 = vld [vmem:[%s990_s3 + $0x30] sm:$0xff]  ;;  %v402_v47 = vld [vmem:[%s991_s4 + $0x28] sm:$0xff] }
  0x20   : > { %299 = vmatpush.msra.mxu0 %v286_v7  ;;  %v386_v48 = vld [vmem:[%s990_s3 + $0x28] sm:$0xff]  ;;  %v401_v51 = vld [vmem:[%s991_s4 + $0x20] sm:$0xff]  ;;  %v400_v54 = vld [vmem:[%s991_s4 + $0x18] sm:$0xff] }
  0x21   : > { %436 = vmatpush.msra.mxu2 %v393_v33  ;;  %417 = vmatpush.msra.mxu3 %v408_v34  ;;  %v385_v52 = vld [vmem:[%s990_s3 + $0x20] sm:$0xff]  ;;  %v384_v55 = vld [vmem:[%s990_s3 + $0x18] sm:$0xff]  ;;  %v399_v59 = vld [vmem:[%s991_s4 + $0x10] sm:$0xff] }
  0x22   : > { %300 = vmatpush.msra.mxu0 %v285_v8  ;;  %v383_v60 = vld [vmem:[%s990_s3 + $0x10] sm:$0xff]  ;;  %v398_v62 = vld [vmem:[%s991_s4 + $0x8] sm:$0xff]  ;;  %v397_v4 = vld [vmem:[%s991_s4] sm:$0xff] }
  0x23   : > { %437 = vmatpush.msra.mxu2 %v392_v35  ;;  %418 = vmatpush.msra.mxu3 %v407_v36  ;;  %v382_v63 = vld [vmem:[%s990_s3 + $0x8] sm:$0xff]  ;;  %v381_v5 = vld [vmem:[%s990_s3] sm:$0xff] }
  0x24   : > { %301 = vmatpush.msra.mxu0 %v284_v9 }
  0x25   : > { %438 = vmatpush.msra.mxu2 %v391_v37  ;;  %419 = vmatpush.msra.mxu3 %v406_v38 }
  0x26   : > { %302 = vmatpush.msra.mxu0 %v283_v10 }
  0x27   : > { %439 = vmatpush.msra.mxu2 %v390_v39  ;;  %420 = vmatpush.msra.mxu3 %v405_v41 }
  0x28   : > { %303 = vmatpush.msra.mxu0 %v282_v11 }
  0x29   : > { %440 = vmatpush.msra.mxu2 %v389_v42  ;;  %421 = vmatpush.msra.mxu3 %v404_v43 }
  0x2a   : > { %304 = vmatpush.msra.mxu0 %v281_v12 }
  0x2b   : > { %441 = vmatpush.msra.mxu2 %v388_v44  ;;  %422 = vmatpush.msra.mxu3 %v403_v45 }
  0x2c   : > { %305 = vmatpush.msra.mxu0 %v280_v13 }
  0x2d   : > { %442 = vmatpush.msra.mxu2 %v387_v46  ;;  %423 = vmatpush.msra.mxu3 %v402_v47 }
  0x2e   : > { %306 = vmatpush.msra.mxu0 %v279_v14 }
  0x2f   : > { %443 = vmatpush.msra.mxu2 %v386_v48  ;;  %424 = vmatpush.msra.mxu3 %v401_v51 }
  0x30   : > { %307 = vmatpush.msra.mxu0 %v278_v15 }
  0x31   : > { %444 = vmatpush.msra.mxu2 %v385_v52  ;;  %425 = vmatpush.msra.mxu3 %v400_v54 }
  0x32   : > { %308 = vmatpush.msra.mxu0 %v277_v16 }
  0x33   : > { %309 = vmatmul.f32.vlgmr.msra.gmra.mxu0 %v839_v17  ;;  %445 = vmatpush.msra.mxu2 %v384_v55 }
  0x34   : > { %426 = vmatpush.msra.mxu3 %v399_v59 }
  0x35   : > { %446 = vmatpush.msra.mxu2 %v383_v60 }
  0x36   : > { %427 = vmatpush.msra.mxu3 %v398_v62 }
  0x37   : > { %447 = vmatpush.msra.mxu2 %v382_v63 }
  0x38   : > { %428 = vmatpush.msra.mxu3 %v397_v4 }
  0x39   : > { %448 = vmatpush.msra.mxu2 %v381_v5  ;;  %429 = vmatmul.f32.vlgmr.msra.gmra.mxu3 %v839_v17 }
  0xb0   : > { %v310_v18 = vpop.f32.mrf.mxu0 }
  0xb1   : > { %329 = vmatmul.f32.vlgmr.msra.gmra.mxu1 %v310_v18 }
 0x12e   : > { %v330_v19 = vpop.f32.mrf.mxu1 }
 0x12f   : > { %v334_v20 = vsel %vm333_vm0, %v330_v19, -inf }
 0x130   : > { %335 = vmax.xlane.f32.xlu0 %v334_v20 }
 0x1a3   : > { %v336_v21 = vpop.xlane.xlu0 %335 }
 0x1a4   : > { %v337_v22 = vsub.f32 %v330_v19, %v336_v21 }
 0x1a6   : > { %v338_v23 = vmul.f32 1.442695, %v337_v22 }
 0x1a8   : > { %626 = vpow2.f32 %v338_v23 }
 0x1ae   : > { %v843_v24 = vpop.eup %626 }
 0x1af   : > { %v340_v25 = vsel %vm333_vm0, %v843_v24, 0.0 }
 0x1b0   : > { %341 = vadd.xlane.f32.xlu0 %v340_v25 }
 0x223   : > { %v342_v40 = vpop.xlane.xlu0 %341 }
 0x224   : > { %628 = vrcp.f32 %v342_v40  ;;  %v354_v56 = vand.u32 2147483648, %v342_v40  ;;  %v352_v58 = vand.u32 2147483647, %v342_v40  ;;  %vm348_vm2 = vweird.f32 %v342_v40 }
 0x226   : > { %v355_v0 = vor.u32 1.1754944e-38, %v354_v56  ;;  %vm353_vm4 = vcmp.eq.f32.partialorder %v352_v58, 8.507059e+37 }
 0x22a   : > { %v629_v49 = vpop.eup %628 }
 0x22b   : > { %v344_v50 = vmul.f32 %v629_v49, %v342_v40  ;;  %vm349_vm1 = vweird.f32 %v629_v49 }
 0x22c   : > { %vm350_vm3 = vmor %vm348_vm2, %vm349_vm1 }
 0x22d   : > { %v345_v53 = vsub.f32 1.0, %v344_v50 }
 0x22f   : > { %v346_v57 = vmul.f32 %v629_v49, %v345_v53 }
 0x231   : > { %v347_v61 = vadd.f32 %v629_v49, %v346_v57 }
 0x233   : > { %v351_v1 = vsel %vm350_vm3, %v629_v49, %v347_v61 }
 0x234   : > { %v356_v2 = vsel %vm353_vm4, %v355_v0, %v351_v1 }
 0x235   : > { %v357_v3 = vmul.f32 %v843_v24, %v356_v2 }
 0x237   : > { %582 = vmatmul.msk.f32.vlgmr.msrb.gmra.mxu1 %vm333_vm0, %v357_v3  ;;  %455 = vst.msk [vmem:[%s262_s12] sm:$0xff] %vm333_vm0, %v357_v3 }
 0x2b4   : > { %v378_v6 = vpop.f32.mrf.mxu1 }
 0x2b5   : > { %449 = vmatmul.f32.vlgmr.msra.gmra.mxu2 %v378_v6 }
 0x2b6   : > { %659 = shalt.err (!%p656_p3)
}
 0x2b7   : > { %587 = dma.vmem_to_hbm [thread:$0]  (%p769_p5), %s477_s29, 128, %s479_s9, %s461_s10   ;;  %v430_v7 = vpop.f32.mrf.mxu3 }
 0x2b8   : > { %s274_s19 = scalar_lea.vmem %s992_s5, %s793_s18 }
 0x338   : > { %v450_v8 = vpop.f32.mrf.mxu2 }
 0x339   : > { %v451_v9 = vadd.f32 %v450_v8, %v430_v7 }
 0x33b   : > { %630 = vtanh.f32 %v451_v9 }
 0x341   : > { %v631_v10 = vpop.eup %630 }
 0x342   : > { %454 = vst [vmem:[%s274_s19] sm:$0xff] %v631_v10 }
 0x343 PF: > { %p593_p4 = scmp.ge.s32.totalorder %s694_s24, 2  ;;  %s497_s26 = sand.u32 1, %s682_s21  }
 0x344   : > { %s498_s7 = scalar_lea.sflag [#allocation3], %s497_s26 }
 0x345   : > { %p590_p7 = pnand %p593_p4, %p773_p6 }
 0x347   : > { %p591_p8 = pneg %p590_p7 }
 0x349   : > { %677 = dma.done.wait (%p591_p8), %s498_s7, 128  }
 0x34a   : > { %679 = vsyncadd (%p591_p8), %s498_s7, 4294967168  ;;  %p17_p5 = scmp.ge.s32.totalorder %s756_s27, 4   ;;  %s996_s21 = smov %s686_s22 }
 0x34b   : > { %s997_s22 = smov %s690_s23  ;;  %s998_s23 = smov %s767_s30 }
 0x34c   : > { %s999_s24 = smov %s756_s27  ;;  %19 = sbr.rel (!%p17_p5) target bundleno = 3 (0x3), region = 90 }
 0x351   :  { %504 = vsyncpa [#allocation3], 1 }
 0x352   :  { %506 = vsyncpa [#allocation3 + $0x1], 1 }

</bundles_post_ra>
